<compile_context>
chip_gen: v5e
topology: v5e:2x2
jax: 0.10.0
libtpu: 0.0.40
codegen_flags: <defaults>
</compile_context>

<pallas_src>
import jax
import jax.numpy as jnp
from jax.experimental import pallas as pl
from jax.experimental.pallas import tpu as pltpu


# ---------------------------------------------------------------------------
# Pallas kernel: per-mode complex channel contraction
#   out[b, o, m] = sum_i x[b, i, m] * w[i, o, m]      (complex multiply)
# ---------------------------------------------------------------------------
def _spectral_contract_kernel(x_ref, w_ref, o_ref):
    """x_ref: (1, 2*C_in, tM)   rows [0:C_in]=Re(x),  [C_in:]=Im(x)
       w_ref: (2*C_in, C_out, tM) rows [0:C_in]=Re(w), [C_in:]=Im(w)
       o_ref: (1, 2*C_out, tM)  rows [0:C_out]=Re(out), [C_out:]=Im(out)
    """
    c_in = w_ref.shape[0] // 2
    c_out = w_ref.shape[1]
    tm = x_ref.shape[2]

    x = x_ref[0]                                     # (2*C_in, tM)

    acc_r = jnp.zeros((c_out, tm), jnp.float32)
    acc_i = jnp.zeros((c_out, tm), jnp.float32)
    # C_in is small: static unroll on the VPU (elementwise mul + add); the
    # (1, tM) x rows broadcast across the C_out sublanes of each weight tile.
    for i in range(c_in):
        a = x[i:i + 1, :]                            # (1, tM) Re(x_i)
        b = x[c_in + i:c_in + i + 1, :]              # (1, tM) Im(x_i)
        wr = w_ref[i]                                # (C_out, tM)
        wi = w_ref[c_in + i]
        acc_r = acc_r + a * wr - b * wi
        acc_i = acc_i + a * wi + b * wr

    # Single sublane/lane-dense store of the whole (2*C_out, tM) slab
    # (real + imag together fill the sublanes even when C_out < 8).
    o_ref[0] = jnp.concatenate([acc_r, acc_i], axis=0)


def _choose_mode_tile(c_in, c_out, m):
    """Pick the lane tile for the flattened mode axis.

    Big enough to be lane-dense (>=128, ideally 512), small enough that
    (a) the (C_out, tM) f32 accumulator pair stays well inside the vreg file
    and (b) the double-buffered weight block stays well under scoped VMEM on
    every generation (v5e 16 MiB default scoped limit, v7x 64 MiB physical).
    """
    t = 512
    t = min(t, max(128, (16384 // max(c_out, 1)) // 128 * 128))            # accumulators
    t = min(t, max(128, (262144 // max(c_in * c_out, 1)) // 128 * 128))    # weight VMEM
    m128 = -(-m // 128) * 128
    t = min(t, m128)
    mp = -(-m // t) * t
    return t, mp


def spectral_contract(x_ft_modes, w_modes):
    """Complex contraction over input channels, per Fourier mode.

    x_ft_modes: (B, C_in, M) complex64
    w_modes:    (C_in, C_out, M) complex64
    returns:    (B, C_out, M) complex64
    """
    B, C_in, M = x_ft_modes.shape
    C_out = w_modes.shape[1]
    tM, Mp = _choose_mode_tile(C_in, C_out, M)
    pad = Mp - M
    grid_m = Mp // tM

    # Stack real/imag on the sublane (channel) axis: one f32 stream per
    # operand instead of separate real/imag arrays.
    x_pack = jnp.concatenate(
        [jnp.real(x_ft_modes), jnp.imag(x_ft_modes)], axis=1).astype(jnp.float32)
    x_pack = jnp.pad(x_pack, ((0, 0), (0, 0), (0, pad)))          # (B, 2*C_in, Mp)
    w_pack = jnp.concatenate(
        [jnp.real(w_modes), jnp.imag(w_modes)], axis=0).astype(jnp.float32)
    w_pack = jnp.pad(w_pack, ((0, 0), (0, 0), (0, pad)))          # (2*C_in, C_out, Mp)

    # Grid: mode tiles outer, batch inner -> the weight tile (index depends
    # only on m) is fetched once per mode tile and reused across the batch.
    x_spec = pl.BlockSpec((1, 2 * C_in, tM), lambda m, b: (b, 0, m))
    w_spec = pl.BlockSpec((2 * C_in, C_out, tM), lambda m, b: (0, 0, m))
    o_spec = pl.BlockSpec((1, 2 * C_out, tM), lambda m, b: (b, 0, m))

    blk_bytes = 4 * tM * (2 * C_in + 2 * C_in * C_out + 2 * C_out)
    vmem_limit = int(min(32 * 1024 * 1024, max(16 * 1024 * 1024, 4 * blk_bytes)))

    cost = pl.CostEstimate(
        flops=8 * B * C_in * C_out * Mp,
        transcendentals=0,
        bytes_accessed=4 * (x_pack.size + w_pack.size + B * 2 * C_out * Mp),
    )

    out_pack = pl.pallas_call(
        _spectral_contract_kernel,
        out_shape=jax.ShapeDtypeStruct((B, 2 * C_out, Mp), jnp.float32),
        grid_spec=pltpu.PrefetchScalarGridSpec(
            num_scalar_prefetch=0,
            grid=(grid_m, B),
            in_specs=[x_spec, w_spec],
            out_specs=o_spec,
        ),
        compiler_params=pltpu.CompilerParams(
            dimension_semantics=("parallel", "parallel"),
            vmem_limit_bytes=vmem_limit,
        ),
        cost_estimate=cost,
    )(x_pack, w_pack)

    out_r = out_pack[:, :C_out, :M]
    out_i = out_pack[:, C_out:, :M]
    return (out_r + 1j * out_i).astype(jnp.complex64)


# ---------------------------------------------------------------------------
# Joint "main conv" parameters + SubConv forward
# ---------------------------------------------------------------------------
def make_joint_spectral_conv_params(n_layers, in_channels, out_channels, n_modes, key):
    m1, m2 = n_modes
    scale = 1.0 / (in_channels * out_channels)
    k1, k2, k3 = jax.random.split(key, 3)
    # weight: (n_layers, 2 corner blocks, C_in, C_out, m1, m2) complex64
    wr = scale * jax.random.normal(
        k1, (n_layers, 2, in_channels, out_channels, m1, m2), jnp.float32)
    wi = scale * jax.random.normal(
        k2, (n_layers, 2, in_channels, out_channels, m1, m2), jnp.float32)
    bias = scale * jax.random.normal(k3, (n_layers, out_channels), jnp.float32)
    return {"weight": (wr + 1j * wi).astype(jnp.complex64),
            "bias": bias,
            "n_modes": (m1, m2)}


def sub_conv_forward(params, x, indices):
    """Equivalent of SubConv(main_conv, indices).forward(x)."""
    B, C_in, H, W = x.shape
    m1, m2 = params["n_modes"]
    w = params["weight"][indices]      # (2, C_in, C_out, m1, m2) complex64
    bias = params["bias"][indices]     # (C_out,)
    C_out = w.shape[2]

    # TODO(synk): FFT/IFFT have no Pallas equivalent; computed with jnp.fft.
    x_ft = jnp.fft.rfft2(x.astype(jnp.float32), axes=(-2, -1))  # (B, C_in, H, W//2+1)

    # Retained corner modes, flattened along a single (lane-dense) mode axis.
    # Keeping the flatten in the wrapper is deliberate: an in-kernel corner
    # extraction would leave m2 (<<128) as the lane dim and waste most lanes.
    top = x_ft[:, :, :m1, :m2]
    bot = x_ft[:, :, H - m1:, :m2]
    x_modes = jnp.concatenate(
        [top.reshape(B, C_in, m1 * m2), bot.reshape(B, C_in, m1 * m2)], axis=-1)
    w_modes = jnp.concatenate(
        [w[0].reshape(C_in, C_out, m1 * m2), w[1].reshape(C_in, C_out, m1 * m2)],
        axis=-1)

    out_modes = spectral_contract(x_modes, w_modes)   # (B, C_out, 2*m1*m2)

    out_ft = jnp.zeros((B, C_out, H, W // 2 + 1), jnp.complex64)
    out_top = out_modes[..., :m1 * m2].reshape(B, C_out, m1, m2)
    out_bot = out_modes[..., m1 * m2:].reshape(B, C_out, m1, m2)
    out_ft = out_ft.at[:, :, :m1, :m2].set(out_top)
    out_ft = out_ft.at[:, :, H - m1:, :m2].set(out_bot)

    y = jnp.fft.irfft2(out_ft, s=(H, W), axes=(-2, -1))
    y = y + bias[None, :, None, None]
    return y.astype(x.dtype)


def sub_conv_reference(params, x, indices):
    """Pure-JAX reference (no Pallas) for numerical validation."""
    B, C_in, H, W = x.shape
    m1, m2 = params["n_modes"]
    w = params["weight"][indices]
    bias = params["bias"][indices]
    C_out = w.shape[2]

    x_ft = jnp.fft.rfft2(x.astype(jnp.float32), axes=(-2, -1))
    out_ft = jnp.zeros((B, C_out, H, W // 2 + 1), jnp.complex64)
    out_ft = out_ft.at[:, :, :m1, :m2].set(
        jnp.einsum("bixy,ioxy->boxy", x_ft[:, :, :m1, :m2], w[0]))
    out_ft = out_ft.at[:, :, H - m1:, :m2].set(
        jnp.einsum("bixy,ioxy->boxy", x_ft[:, :, H - m1:, :m2], w[1]))
    y = jnp.fft.irfft2(out_ft, s=(H, W), axes=(-2, -1))
    return (y + bias[None, :, None, None]).astype(x.dtype)


if __name__ == "__main__":
    key = jax.random.PRNGKey(0)
    k_x, k_p = jax.random.split(key)

    B, C_in, C_out, H, W = 2, 4, 4, 16, 16
    n_modes = (4, 4)
    n_layers = 3
    indices = 1   # this SubConv owns layer index 1 of the joint weight

    x = jax.random.normal(k_x, (B, C_in, H, W), jnp.float32)
    params = make_joint_spectral_conv_params(n_layers, C_in, C_out, n_modes, k_p)

    y = sub_conv_forward(params, x, indices)
    y = jax.block_until_ready(y)

    y_ref = jax.block_until_ready(sub_conv_reference(params, x, indices))
    assert y.shape == (B, C_out, H, W)
    assert jnp.allclose(y, y_ref, rtol=1e-4, atol=1e-5), "mismatch vs reference"

    print("KERNEL_OK")
</pallas_src>

<mosaic_0001>
module attributes {stable_mosaic.version = 11 : i64} {
  func.func @_spectral_contract_kernel(%arg0: i32, %arg1: i32, %arg2: memref<1x8x128xf32, #tpu.memory_space<vmem>>, %arg3: memref<8x4x128xf32, #tpu.memory_space<vmem>>, %arg4: memref<1x8x128xf32, #tpu.memory_space<vmem>>) attributes {dimension_semantics = [#tpu.dimension_semantics<parallel>, #tpu.dimension_semantics<parallel>], iteration_bounds = array<i64: 1, 2>, scalar_prefetch = 0 : i64, scratch_operands = 0 : i64, tpu.core_type = #tpu.core_type<tc>, window_params = [{transform_indices = @transform_0, window_bounds = array<i64: 1, 8, 128>}, {transform_indices = @transform_1, window_bounds = array<i64: 8, 4, 128>}, {transform_indices = @transform_2, window_bounds = array<i64: 1, 8, 128>}]} {
    %c0 = arith.constant 0 : index
    %c0_0 = arith.constant 0 : index
    %c0_1 = arith.constant 0 : index
    %0 = vector.load %arg2[%c0, %c0_0, %c0_1] : memref<1x8x128xf32, #tpu.memory_space<vmem>>, vector<1x8x128xf32>
    %1 = vector.shape_cast %0 : vector<1x8x128xf32> to vector<8x128xf32>
    %cst = arith.constant 0.000000e+00 : f32
    %2 = vector.broadcast %cst : f32 to vector<4x128xf32>
    %cst_2 = arith.constant 0.000000e+00 : f32
    %3 = vector.broadcast %cst_2 : f32 to vector<4x128xf32>
    %4 = vector.extract_strided_slice %1 {offsets = [0, 0], sizes = [1, 128], strides = [1, 1]} : vector<8x128xf32> to vector<1x128xf32>
    %5 = vector.extract_strided_slice %1 {offsets = [4, 0], sizes = [1, 128], strides = [1, 1]} : vector<8x128xf32> to vector<1x128xf32>
    %c0_3 = arith.constant 0 : index
    %c0_4 = arith.constant 0 : index
    %c0_5 = arith.constant 0 : index
    %6 = vector.load %arg3[%c0_3, %c0_4, %c0_5] : memref<8x4x128xf32, #tpu.memory_space<vmem>>, vector<1x4x128xf32>
    %7 = vector.shape_cast %6 : vector<1x4x128xf32> to vector<4x128xf32>
    %c4 = arith.constant 4 : index
    %c0_6 = arith.constant 0 : index
    %c0_7 = arith.constant 0 : index
    %8 = vector.load %arg3[%c4, %c0_6, %c0_7] : memref<8x4x128xf32, #tpu.memory_space<vmem>>, vector<1x4x128xf32>
    %9 = vector.shape_cast %8 : vector<1x4x128xf32> to vector<4x128xf32>
    %10 = vector.broadcast %4 : vector<1x128xf32> to vector<4x128xf32>
    %11 = arith.mulf %10, %7 : vector<4x128xf32>
    %12 = arith.addf %2, %11 : vector<4x128xf32>
    %13 = vector.broadcast %5 : vector<1x128xf32> to vector<4x128xf32>
    %14 = arith.mulf %13, %9 : vector<4x128xf32>
    %15 = arith.subf %12, %14 : vector<4x128xf32>
    %16 = vector.broadcast %4 : vector<1x128xf32> to vector<4x128xf32>
    %17 = arith.mulf %16, %9 : vector<4x128xf32>
    %18 = arith.addf %3, %17 : vector<4x128xf32>
    %19 = vector.broadcast %5 : vector<1x128xf32> to vector<4x128xf32>
    %20 = arith.mulf %19, %7 : vector<4x128xf32>
    %21 = arith.addf %18, %20 : vector<4x128xf32>
    %22 = vector.extract_strided_slice %1 {offsets = [1, 0], sizes = [1, 128], strides = [1, 1]} : vector<8x128xf32> to vector<1x128xf32>
    %23 = vector.extract_strided_slice %1 {offsets = [5, 0], sizes = [1, 128], strides = [1, 1]} : vector<8x128xf32> to vector<1x128xf32>
    %c1 = arith.constant 1 : index
    %c0_8 = arith.constant 0 : index
    %c0_9 = arith.constant 0 : index
    %24 = vector.load %arg3[%c1, %c0_8, %c0_9] : memref<8x4x128xf32, #tpu.memory_space<vmem>>, vector<1x4x128xf32>
    %25 = vector.shape_cast %24 : vector<1x4x128xf32> to vector<4x128xf32>
    %c5 = arith.constant 5 : index
    %c0_10 = arith.constant 0 : index
    %c0_11 = arith.constant 0 : index
    %26 = vector.load %arg3[%c5, %c0_10, %c0_11] : memref<8x4x128xf32, #tpu.memory_space<vmem>>, vector<1x4x128xf32>
    %27 = vector.shape_cast %26 : vector<1x4x128xf32> to vector<4x128xf32>
    %28 = vector.broadcast %22 : vector<1x128xf32> to vector<4x128xf32>
    %29 = arith.mulf %28, %25 : vector<4x128xf32>
    %30 = arith.addf %15, %29 : vector<4x128xf32>
    %31 = vector.broadcast %23 : vector<1x128xf32> to vector<4x128xf32>
    %32 = arith.mulf %31, %27 : vector<4x128xf32>
    %33 = arith.subf %30, %32 : vector<4x128xf32>
    %34 = vector.broadcast %22 : vector<1x128xf32> to vector<4x128xf32>
    %35 = arith.mulf %34, %27 : vector<4x128xf32>
    %36 = arith.addf %21, %35 : vector<4x128xf32>
    %37 = vector.broadcast %23 : vector<1x128xf32> to vector<4x128xf32>
    %38 = arith.mulf %37, %25 : vector<4x128xf32>
    %39 = arith.addf %36, %38 : vector<4x128xf32>
    %40 = vector.extract_strided_slice %1 {offsets = [2, 0], sizes = [1, 128], strides = [1, 1]} : vector<8x128xf32> to vector<1x128xf32>
    %41 = vector.extract_strided_slice %1 {offsets = [6, 0], sizes = [1, 128], strides = [1, 1]} : vector<8x128xf32> to vector<1x128xf32>
    %c2 = arith.constant 2 : index
    %c0_12 = arith.constant 0 : index
    %c0_13 = arith.constant 0 : index
    %42 = vector.load %arg3[%c2, %c0_12, %c0_13] : memref<8x4x128xf32, #tpu.memory_space<vmem>>, vector<1x4x128xf32>
    %43 = vector.shape_cast %42 : vector<1x4x128xf32> to vector<4x128xf32>
    %c6 = arith.constant 6 : index
    %c0_14 = arith.constant 0 : index
    %c0_15 = arith.constant 0 : index
    %44 = vector.load %arg3[%c6, %c0_14, %c0_15] : memref<8x4x128xf32, #tpu.memory_space<vmem>>, vector<1x4x128xf32>
    %45 = vector.shape_cast %44 : vector<1x4x128xf32> to vector<4x128xf32>
    %46 = vector.broadcast %40 : vector<1x128xf32> to vector<4x128xf32>
    %47 = arith.mulf %46, %43 : vector<4x128xf32>
    %48 = arith.addf %33, %47 : vector<4x128xf32>
    %49 = vector.broadcast %41 : vector<1x128xf32> to vector<4x128xf32>
    %50 = arith.mulf %49, %45 : vector<4x128xf32>
    %51 = arith.subf %48, %50 : vector<4x128xf32>
    %52 = vector.broadcast %40 : vector<1x128xf32> to vector<4x128xf32>
    %53 = arith.mulf %52, %45 : vector<4x128xf32>
    %54 = arith.addf %39, %53 : vector<4x128xf32>
    %55 = vector.broadcast %41 : vector<1x128xf32> to vector<4x128xf32>
    %56 = arith.mulf %55, %43 : vector<4x128xf32>
    %57 = arith.addf %54, %56 : vector<4x128xf32>
    %58 = vector.extract_strided_slice %1 {offsets = [3, 0], sizes = [1, 128], strides = [1, 1]} : vector<8x128xf32> to vector<1x128xf32>
    %59 = vector.extract_strided_slice %1 {offsets = [7, 0], sizes = [1, 128], strides = [1, 1]} : vector<8x128xf32> to vector<1x128xf32>
    %c3 = arith.constant 3 : index
    %c0_16 = arith.constant 0 : index
    %c0_17 = arith.constant 0 : index
    %60 = vector.load %arg3[%c3, %c0_16, %c0_17] : memref<8x4x128xf32, #tpu.memory_space<vmem>>, vector<1x4x128xf32>
    %61 = vector.shape_cast %60 : vector<1x4x128xf32> to vector<4x128xf32>
    %c7 = arith.constant 7 : index
    %c0_18 = arith.constant 0 : index
    %c0_19 = arith.constant 0 : index
    %62 = vector.load %arg3[%c7, %c0_18, %c0_19] : memref<8x4x128xf32, #tpu.memory_space<vmem>>, vector<1x4x128xf32>
    %63 = vector.shape_cast %62 : vector<1x4x128xf32> to vector<4x128xf32>
    %64 = vector.broadcast %58 : vector<1x128xf32> to vector<4x128xf32>
    %65 = arith.mulf %64, %61 : vector<4x128xf32>
    %66 = arith.addf %51, %65 : vector<4x128xf32>
    %67 = vector.broadcast %59 : vector<1x128xf32> to vector<4x128xf32>
    %68 = arith.mulf %67, %63 : vector<4x128xf32>
    %69 = arith.subf %66, %68 : vector<4x128xf32>
    %70 = vector.broadcast %58 : vector<1x128xf32> to vector<4x128xf32>
    %71 = arith.mulf %70, %63 : vector<4x128xf32>
    %72 = arith.addf %57, %71 : vector<4x128xf32>
    %73 = vector.broadcast %59 : vector<1x128xf32> to vector<4x128xf32>
    %74 = arith.mulf %73, %61 : vector<4x128xf32>
    %75 = arith.addf %72, %74 : vector<4x128xf32>
    %76 = tpu.concatenate %69, %75 in 0 : vector<4x128xf32>, vector<4x128xf32> -> vector<8x128xf32>
    %c0_20 = arith.constant 0 : index
    %c0_21 = arith.constant 0 : index
    %c0_22 = arith.constant 0 : index
    %77 = vector.load %arg4[%c0_20, %c0_21, %c0_22] : memref<1x8x128xf32, #tpu.memory_space<vmem>>, vector<1x8x128xf32>
    %78 = vector.shape_cast %77 : vector<1x8x128xf32> to vector<8x128xf32>
    %79 = vector.shape_cast %76 : vector<8x128xf32> to vector<1x8x128xf32>
    tpu.vector_store %arg4[%c0_20, %c0_21, %c0_22], %79 {strides = array<i32>} : memref<1x8x128xf32, #tpu.memory_space<vmem>>, vector<1x8x128xf32>,
    return
  }
  func.func @transform_0(%arg0: i32, %arg1: i32) -> (i32, i32, i32) {
    %c0_i32 = arith.constant 0 : i32
    %c0_i32_0 = arith.constant 0 : i32
    return %arg1, %c0_i32, %arg0 : i32, i32, i32
  }
  func.func @transform_1(%arg0: i32, %arg1: i32) -> (i32, i32, i32) {
    %c0_i32 = arith.constant 0 : i32
    %c0_i32_0 = arith.constant 0 : i32
    %c0_i32_1 = arith.constant 0 : i32
    return %c0_i32, %c0_i32_0, %arg0 : i32, i32, i32
  }
  func.func @transform_2(%arg0: i32, %arg1: i32) -> (i32, i32, i32) {
    %c0_i32 = arith.constant 0 : i32
    %c0_i32_0 = arith.constant 0 : i32
    return %arg1, %c0_i32, %arg0 : i32, i32, i32
  }
}

</mosaic_0001>

<bundles_post_ra>
// kernel: tpu_custom_call.1
= control target key start
LH: loop header
LB: loop body
LE: loop exit
PB: predicated region body
PF: predicated region fallthrough
CT: control target
= control target key end

     0   :  { %7 = vsyncpa [#allocation3], 0  ;;  %s776_s0 = inlined_call_operand.hbm [shape: f32[2,8,128], index: 0, kind: input, shape index: {}]   ;;  %s777_s1 = inlined_call_operand.hbm [shape: f32[8,4,128], index: 1, kind: input, shape index: {}]   ;;  %s778_s2 = inlined_call_operand.hbm [shape: f32[2,8,128], index: 2, kind: output, shape index: {}]  }
   0x1   :  { %9 = vsyncpa [#allocation3 + $0x1], 0 }
   0x2   :  { %10 = vsyncpa [#allocation6], 0 }
   0x3   :  { %11 = vsyncpa [#allocation4], 0 }
   0x4   :  { %13 = vsyncpa [#allocation4 + $0x1], 0  ;;  %s629_s9 = smov 0   ;;  %s631_s10 = smov 0  }
   0x5   :  { %s633_s11 = smov 0   ;;  %s635_s12 = smov 0  }
   0x6   :  { %s637_s13 = smov 0   ;;  %s639_s14 = smov 0  }
   0x7 LB: > { %s373_s15 = sadd.s32 4294967295, %s609_s14   ;;  %p375_p0 = scmp.ge.s32.totalorder %s609_s14, 1  ;;  %s609_s14 = sphi %s639_s14, %s19_s14   ;;  %s605_s13 = sphi %s637_s13, %s789_s13   ;;  %s601_s12 = sphi %s635_s12, %s788_s12   ;;  %s597_s11 = sphi %s633_s11, %s787_s11   ;;  %s593_s10 = sphi %s631_s10, %s786_s10   ;;  %s589_s9 = sphi %s629_s9, %s785_s9  }
   0x8   : > { %p661_p1 = scmp.eq.s32.totalorder %s373_s15, 0  ;;  %p118_p2 = scmp.lt.s32.totalorder %s609_s14, 3 }
   0x9   : > { %s131_s19 = sshll.u32 %s777_s1, 4  ;;  %s611_s21 = smov [#allocation5]   ;;  %s132_s19 = int_to_ptr.hbm [resolvable:$true] %s131_s19 }
   0xa   : > { %p669_p3 = pnand %p375_p0, %p118_p2  ;;  %s133_s22 = sshll.u32 %s611_s21, 4  ;;  %s134_s22 = int_to_ptr.vmem [resolvable:$true] %s133_s22 }
   0xb   : > { %p377_p6 = scmp.ge.s32.totalorder %s609_s14, 2  ;;  %s612_s23 = smov 64  }
   0xc   : > { %p396_p4 = pneg %p669_p3  ;;  %s613_s24 = smov 4  }
   0xd   : > { %s374_s25 = sadd.s32 4294967294, %s609_s14   ;;  %s28_s26 = sadd.s32 1, %s605_s13 }
   0xe   : > { %p397_p5 = pnand %p396_p4, %p661_p1  ;;  %s40_s27 = sadd.s32 1, %s597_s11 }
   0xf   : > { %p29_p7 = scmp.ge.s32.totalorder %s28_s26, 2  ;;  %p47_p8 = scmp.ne.s32.totalorder %s597_s11, %s593_s10 }
  0x10   : > { %399 = dma.hbm_to_vmem [thread:$0]  (!%p397_p5), %s132_s19, 512, %s134_s22, [#allocation6], %s612_s23, %s612_s23, %s613_s24  }
  0x11   : > { %p48_p9 = scmp.eq.s32.totalorder %s609_s14, 0  ;;  %p53_p10 = scmp.ne.s32.totalorder %s593_s10, %s589_s9 }
  0x12   : > { %s791_s26 = smov (%p29_p7, %s28_s26), 0  ;;  %p105_p13 = scmp.eq.s32.totalorder %s373_s15, 1 }
  0x13   : > { %p688_p11 = por %p48_p9, %p47_p8  ;;  %p694_p12 = por %p661_p1, %p53_p10 }
  0x14   : > { %s35_s30 = ssub.s32 %s605_s13, %s791_s26  ;;  %p111_p2 = scmp.eq.s32.totalorder %s374_s25, 1 }
  0x15   : > { %p38_p0 = scmp.eq.s32.totalorder %s35_s30, 0  ;;  %p700_p4 = por %p105_p13, %p47_p8 }
  0x16   : > { %p409_p5 = scmp.lt.s32.totalorder %s609_s14, 2  ;;  %p708_p7 = por %p111_p2, %p53_p10 }
  0x17   : > { %s706_s4 = scalar_select %p38_p0, %s597_s11, %s40_s27  }
  0x18   : > { %s147_s6 = sand.u32 1, %s597_s11   ;;  %s379_s8 = sshll.u32 %s605_s13, 3 }
  0x19   : > { %s378_s7 = sshll.u32 %s147_s6, 3  ;;  %s156_s15 = scalar_lea.hbm %s776_s0, %s379_s8 }
  0x1a   : > { %s151_s19 = scalar_lea.vmem [#allocation2], %s378_s7  ;;  %s158_s22 = sshll.u32 %s156_s15, 4  ;;  %s159_s22 = int_to_ptr.hbm [resolvable:$true] %s158_s22 }
  0x1b   : > { %s160_s21 = sshll.u32 %s151_s19, 4  ;;  %p401_p8 = pnand %p409_p5, %p688_p11  ;;  %s161_s21 = int_to_ptr.vmem [resolvable:$true] %s160_s21 }
  0x1c   : > { %s148_s23 = scalar_lea.sflag [#allocation3], %s147_s6  ;;  %169 = sbr.rel (%p669_p3) target bundleno = 61 (0x3d), region = 28 }
  0x1d   : > { %403 = dma.hbm_to_vmem [thread:$0]  (!%p401_p8), %s159_s22, 128, %s161_s21, %s148_s23  }
  0x1e   : > { %s722_s24 = sand.u32 (!%p669_p3), 1, %s593_s10  }
  0x1f   : > { %s381_s25 = sshll.u32 (!%p669_p3), %s722_s24, 3  ;;  %s172_s27 = scalar_lea.sflag (!%p669_p3), [#allocation3], %s722_s24 }
  0x20   : > { %s175_s30 = scalar_lea.vmem (!%p669_p3), [#allocation2], %s381_s25 }
  0x21   : > { %576 = dma.done.wait (%p694_p12), %s172_s27, 128  }
  0x22   : > { %578 = vsyncadd (%p694_p12), %s172_s27, 4294967168 }
  0x23   : > { %580 = dma.done.wait (%p661_p1), [#allocation6], 512  }
  0x24   : > { %582 = vsyncadd (%p661_p1), [#allocation6], 4294966784  ;;  %v202_v0 = vld [vmem:[%s175_s30] sm:$0xff]  ;;  %v203_v1 = vld [vmem:[#allocation5] sm:$0xf]  ;;  %s385_s16 = sshll.u32 %s601_s12, 3 }
  0x25   : > { %v205_v2 = vld [vmem:[#allocation5 + $0x10] sm:$0xf]  ;;  %v206_v3 = vperm.slane %v202_v0, 0  ;;  %v209_v4 = vperm.slane %v202_v0, 4  ;;  %v217_v5 = vld [vmem:[#allocation5 + $0x4] sm:$0xf]  ;;  %s276_s29 = scalar_lea.hbm %s778_s2, %s385_s16 }
  0x26   : > { %v219_v6 = vld [vmem:[#allocation5 + $0x14] sm:$0xf]  ;;  %v220_v7 = vperm.slane %v202_v0, 1  ;;  %v223_v8 = vperm.slane %v202_v0, 5  ;;  %v231_v17 = vld [vmem:[#allocation5 + $0x8] sm:$0xf] }
  0x27   : > { %v207_v9 = vmul.f32 %v206_v3, %v203_v1  ;;  %v210_v10 = vmul.f32 %v209_v4, %v205_v2  ;;  %v212_v11 = vmul.f32 %v206_v3, %v205_v2  ;;  %v214_v12 = vmul.f32 %v209_v4, %v203_v1  ;;  %v233_v20 = vld [vmem:[#allocation5 + $0x18] sm:$0xf]  ;;  %v245_v28 = vld [vmem:[#allocation5 + $0xc] sm:$0xf]  ;;  %v247_v29 = vld [vmem:[#allocation5 + $0x1c] sm:$0xf] }
  0x28   : > { %v221_v13 = vmul.f32 %v220_v7, %v217_v5  ;;  %v224_v14 = vmul.f32 %v223_v8, %v219_v6  ;;  %v226_v15 = vmul.f32 %v220_v7, %v219_v6  ;;  %v228_v16 = vmul.f32 %v223_v8, %v217_v5  ;;  %s201_s6 = scalar_lea.vmem [#allocation7], %s381_s25  ;;  %s280_s8 = sshll.u32 %s276_s29, 4  ;;  %s281_s8 = int_to_ptr.hbm [resolvable:$true] %s280_s8 }
  0x29   : > { %v211_v18 = vsub.f32 %v207_v9, %v210_v10  ;;  %v215_v19 = vadd.f32 %v214_v12, %v212_v11  ;;  %v234_v21 = vperm.slane %v202_v0, 2  ;;  %v237_v22 = vperm.slane %v202_v0, 6  ;;  %s278_s7 = sshll.u32 %s201_s6, 4  ;;  %s265_s12 = scalar_lea.sflag [#allocation4], %s722_s24  ;;  %s279_s7 = int_to_ptr.vmem [resolvable:$true] %s278_s7 }
  0x2a   : > { %v248_v26 = vperm.slane %v202_v0, 3  ;;  %v251_v30 = vperm.slane %v202_v0, 7  ;;  %vm261_vm0 = vcmask 1043456   ;;  %s537_s17 = sshra.s32 %s281_s8, 4  ;;  %s543_s21 = scalar_lea.hbm %s778_s2, 16  ;;  %s538_s17 = int_to_ptr.hbm [resolvable:$true] %s537_s17 }
  0x2b   : > { %v222_v23 = vadd.f32 %v221_v13, %v211_v18  ;;  %v227_v24 = vadd.f32 %v226_v15, %v215_v19  ;;  %v235_v25 = vmul.f32 %v234_v21, %v231_v17  ;;  %v240_v27 = vmul.f32 %v234_v21, %v233_v20  ;;  %s539_s18 = scalar_lea.hbm %s538_s17, 8  ;;  %p544_p10 = scmp.lt.s32.totalorder %s538_s17, %s778_s2 }
  0x2c   : > { %v238_v33 = vmul.f32 %v237_v22, %v233_v20  ;;  %v242_v34 = vmul.f32 %v237_v22, %v231_v17  ;;  %v249_v37 = vmul.f32 %v248_v26, %v245_v28  ;;  %v254_v38 = vmul.f32 %v248_v26, %v247_v29  ;;  %p540_p1 = scmp.ne.s32.totalorder %s538_s17, %s539_s18  ;;  %p545_p11 = scmp.lt.s32.totalorder %s543_s21, %s539_s18 }
  0x2d   : > { %v225_v31 = vsub.f32 %v222_v23, %v224_v14  ;;  %v229_v32 = vadd.f32 %v228_v16, %v227_v24  ;;  %v252_v41 = vmul.f32 %v251_v30, %v247_v29  ;;  %v256_v42 = vmul.f32 %v251_v30, %v245_v28 }
  0x2e   : > { %p541_p3 = pnand %p540_p1, %p700_p4  ;;  %p546_p12 = por %p545_p11, %p544_p10 }
  0x2f   : > { %v236_v35 = vadd.f32 %v235_v25, %v225_v31  ;;  %v241_v36 = vadd.f32 %v240_v27, %v229_v32 }
  0x30   : > { %p542_p9 = pneg %p541_p3 }
  0x31   : > { %v239_v39 = vsub.f32 %v236_v35, %v238_v33  ;;  %v243_v40 = vadd.f32 %v242_v34, %v241_v36 }
  0x32   : > { %p547_p13 = pnand %p546_p12, %p542_p9 }
  0x33   : > { %v250_v43 = vadd.f32 %v249_v37, %v239_v39  ;;  %v255_v44 = vadd.f32 %v254_v38, %v243_v40 }
  0x35   : > { %v253_v45 = vsub.f32 %v250_v43, %v252_v41  ;;  %v257_v46 = vadd.f32 %v256_v42, %v255_v44 }
  0x37   : > { %v259_v47 = vrot.slane %v257_v46, 4 }
  0x39   : > { %v262_v48 = vsel %vm261_vm0, %v253_v45, %v259_v47 }
  0x3a   : > { %263 = vst [vmem:[%s201_s6] sm:$0xff] %v262_v48 }
  0x3b   : > { %550 = shalt.err (!%p547_p13)
}
  0x3c   : > { %394 = dma.vmem_to_hbm [thread:$0]  (%p700_p4), %s279_s7, 128, %s281_s8, %s265_s12  }
  0x3d PF: > { %s292_s24 = sand.u32 1, %s589_s9   ;;  %p405_p0 = pnand %p377_p6, %p708_p7 }
  0x3e   : > { %s293_s25 = scalar_lea.sflag [#allocation4], %s292_s24 }
  0x3f   : > { %p406_p2 = pneg %p405_p0 }
  0x41   : > { %584 = dma.done.wait (%p406_p2), %s293_s25, 128  }
  0x42   : > { %586 = vsyncadd (%p406_p2), %s293_s25, 4294967168  ;;  %s19_s14 = sadd.s32 1, %s609_s14   ;;  %s785_s9 = smov %s593_s10 }
  0x43   : > { %p16_p5 = scmp.ge.s32.totalorder %s19_s14, 4   ;;  %s786_s10 = smov %s597_s11 }
  0x44   : > { %s787_s11 = smov %s706_s4  ;;  %s788_s12 = smov %s605_s13 }
  0x45   : > { %s789_s13 = smov %s791_s26  ;;  %18 = sbr.rel (!%p16_p5) target bundleno = 7 (0x7), region = 85 }
  0x4a   :  { %299 = vsyncpa [#allocation3], 1 }
  0x4b   :  { %301 = vsyncpa [#allocation3 + $0x1], 1 }
  0x4c   :  { %302 = vsyncpa [#allocation6], 1 }
  0x4d   :  { %303 = vsyncpa [#allocation4], 1 }
  0x4e   :  { %305 = vsyncpa [#allocation4 + $0x1], 1 }

</bundles_post_ra>
